<compile_context>
chip_gen: v5e
topology: v5e:2x2
jax: 0.10.0
libtpu: 0.0.40
codegen_flags: <defaults>
</compile_context>

<pallas_src>
import jax
import jax.numpy as jnp
from jax.experimental import pallas as pl
from jax.experimental.pallas import tpu as pltpu


# ----------------------------------------------------------------------------- #
# Fused kernel: all GNN cells (layer grid axis) + final fc
# ----------------------------------------------------------------------------- #
def fused_gnn_kernel(x_ref, es_ref, ee_ref, eet_ref,
                     w1_ref, b1_ref, g1_ref, be1_ref,
                     w2_ref, b2_ref, g2_ref, be2_ref,
                     fcw_ref, fcb_ref,
                     o_ref, carry_ref):
    """One grid step == one residual gated graph-conv cell.

    x:     (V, Hmax) f32, zero-padded input node features (Hmax = max(D, H))
    es:    (E, V)    f32  E_start        (layer-invariant, DMA'd once)
    ee:    (E, V)    f32  E_end          (layer-invariant, DMA'd once)
    eet:   (V, E)    f32  E_end^T        (pre-transposed once in the wrapper)
    w1:    (Hmax,5H) f32  [Ui | Uj | Vi | Vj | R] of this layer
    w2:    (H, 4H)   f32  [Ui | Uj | Vi | Vj] of conv step 2
    fcw:   (H, C)    f32  final fc weight (applied on last layer only)
    o:     (V, C)    f32
    carry: (V, Hmax) f32  VMEM scratch, carried across the layer grid axis
    """
    layer = pl.program_id(0)
    n_layers = pl.num_programs(0)
    V, Hmax = carry_ref.shape
    H = g1_ref.shape[-1]

    @pl.when(layer == 0)
    def _():
        carry_ref[...] = x_ref[...]

    xin = carry_ref[...]                    # (V, Hmax)
    es = es_ref[...]                        # (E, V)
    ee = ee_ref[...]                        # (E, V)
    eet = eet_ref[...]                      # (V, E)

    def gated_aggregate(Uix, Ujx, Vix, Vjx):
        # Fuse the two edge-space matmuls that share LHS `es` into one (E, 2H) pass.
        e_sj = jnp.dot(es, jnp.concatenate([Ujx, Vjx], axis=1),
                       preferred_element_type=jnp.float32)            # (E, 2H)
        Ujx_e = e_sj[:, :H]
        Vjx_e = e_sj[:, H:]
        Vix_e = jnp.dot(ee, Vix, preferred_element_type=jnp.float32)  # (E, H)
        gates = jax.nn.sigmoid(Vix_e + Vjx_e)
        # aggregate gated messages back to nodes via the pre-transposed E_end^T
        agg = jnp.dot(eet, gates * Ujx_e, preferred_element_type=jnp.float32)
        return Uix + agg                                              # (V, H)

    def bn_relu(v, gamma, beta):
        # BatchNorm1d, training-mode batch statistics, single pass (E[x^2]-E[x]^2)
        mean = jnp.mean(v, axis=0, keepdims=True)
        meansq = jnp.mean(v * v, axis=0, keepdims=True)
        var = jnp.maximum(meansq - mean * mean, 0.0)
        vn = (v - mean) * jax.lax.rsqrt(var + 1e-5)
        return jnp.maximum(vn * gamma + beta, 0.0)

    # ---- conv step 1 (+ residual projection fused into the same matmul) ----
    proj1 = jnp.dot(xin, w1_ref[0], preferred_element_type=jnp.float32) + b1_ref[0]
    h = gated_aggregate(proj1[:, 0:H], proj1[:, H:2 * H],
                        proj1[:, 2 * H:3 * H], proj1[:, 3 * H:4 * H])
    h = bn_relu(h, g1_ref[0], be1_ref[0])
    res = proj1[:, 4 * H:5 * H]             # R(xin)

    # ---- conv step 2 ----
    proj2 = jnp.dot(h, w2_ref[0], preferred_element_type=jnp.float32) + b2_ref[0]
    h = gated_aggregate(proj2[:, 0:H], proj2[:, H:2 * H],
                        proj2[:, 2 * H:3 * H], proj2[:, 3 * H:4 * H])
    h = bn_relu(h, g2_ref[0], be2_ref[0])

    xout = h + res                          # (V, H) residual cell output

    # carry to next layer (zero-pad feature columns if D > H so shapes line up)
    if Hmax > H:
        carry_ref[...] = jnp.concatenate(
            [xout, jnp.zeros((V, Hmax - H), jnp.float32)], axis=1)
    else:
        carry_ref[...] = xout

    # final fc folded into the last grid iteration: saves a separate pallas_call
    # plus an HBM round-trip of the (V, H) activations
    @pl.when(layer == n_layers - 1)
    def _():
        o_ref[...] = (jnp.dot(xout, fcw_ref[...], preferred_element_type=jnp.float32)
                      + fcb_ref[...])


# ----------------------------------------------------------------------------- #
# pallas_call wrapper (single fused call, layer grid axis)
# ----------------------------------------------------------------------------- #
def gnn_forward_fused(x, es, ee, eet, p):
    V, Hmax = x.shape
    E = es.shape[0]
    Lc, _, fiveH = p["w1"].shape
    H = p["bn1g"].shape[-1]
    C = p["fc_w"].shape[1]

    def inv(shape):       # layer-invariant: same block every grid step (DMA'd once)
        return pl.BlockSpec(shape, lambda l, _n=len(shape): (0,) * _n)

    def per_layer(shape):  # stacked per-layer weights, indexed by the layer grid idx
        return pl.BlockSpec((1,) + shape, lambda l, _n=len(shape): (l,) + (0,) * _n)

    return pl.pallas_call(
        fused_gnn_kernel,
        grid=(Lc,),
        out_shape=jax.ShapeDtypeStruct((V, C), jnp.float32),
        in_specs=[
            inv((V, Hmax)),                 # x (zero-padded node features)
            inv((E, V)),                    # E_start
            inv((E, V)),                    # E_end
            inv((V, E)),                    # E_end^T
            per_layer((Hmax, fiveH)),       # w1  [Ui|Uj|Vi|Vj|R]
            per_layer((1, fiveH)),          # b1
            per_layer((1, H)),              # bn1 gamma
            per_layer((1, H)),              # bn1 beta
            per_layer((H, 4 * H)),          # w2  [Ui|Uj|Vi|Vj]
            per_layer((1, 4 * H)),          # b2
            per_layer((1, H)),              # bn2 gamma
            per_layer((1, H)),              # bn2 beta
            inv((H, C)),                    # fc weight
            inv((1, C)),                    # fc bias
        ],
        out_specs=inv((V, C)),
        scratch_shapes=[pltpu.VMEM((V, Hmax), jnp.float32)],   # layer carry
        compiler_params=pltpu.CompilerParams(
            dimension_semantics=("arbitrary",),                # sequential layer carry
            vmem_limit_bytes=32 * 1024 * 1024,                 # safe on v5e/v6e/v7x
        ),
    )(x, es, ee, eet,
      p["w1"], p["b1"], p["bn1g"], p["bn1b"],
      p["w2"], p["b2"], p["bn2g"], p["bn2b"],
      p["fc_w"], p["fc_b"])


# ----------------------------------------------------------------------------- #
# Parameter construction (mirrors the PyTorch module; weights stored (in, out),
# the five node projections concatenated, and all layers stacked on a lead axis)
# ----------------------------------------------------------------------------- #
def _uniform(key, shape, scale):
    return jax.random.uniform(key, shape, jnp.float32, minval=-scale, maxval=scale)


def init_graphconvnet_params(key, D, H, L, n_components):
    Lc = L // 2
    dims = [D] + [H] * L
    Hmax = max(D, H)
    keys = jax.random.split(key, Lc + 1)

    w1s, w2s = [], []
    for layer in range(Lc):
        Hin = dims[2 * layer]
        Hout = dims[2 * layer + 2]
        ks = jax.random.split(keys[layer], 9)
        s1 = (2.0 / Hin) ** 0.5
        s2 = (2.0 / Hout) ** 0.5
        # conv step 1 + residual: [Ui | Uj | Vi | Vj | R], shape (Hin, 5H)
        w1 = jnp.concatenate([_uniform(ks[i], (Hin, Hout), s1) for i in range(4)]
                             + [_uniform(ks[8], (Hin, Hout), s1)], axis=1)
        if Hin < Hmax:                       # zero-pad rows so all layers stack
            w1 = jnp.pad(w1, ((0, Hmax - Hin), (0, 0)))
        # conv step 2: [Ui | Uj | Vi | Vj], shape (Hout, 4H)
        w2 = jnp.concatenate([_uniform(ks[4 + i], (Hout, Hout), s2) for i in range(4)],
                             axis=1)
        w1s.append(w1)
        w2s.append(w2)

    Hf = dims[-1]
    fc_scale = (2.0 / Hf) ** 0.5             # init_weights_Graph_OurConvNet, gain=1
    return {
        "w1": jnp.stack(w1s),                               # (Lc, Hmax, 5H)
        "b1": jnp.zeros((Lc, 1, 5 * Hf), jnp.float32),
        "bn1g": jnp.ones((Lc, 1, Hf), jnp.float32),
        "bn1b": jnp.zeros((Lc, 1, Hf), jnp.float32),
        "w2": jnp.stack(w2s),                               # (Lc, H, 4H)
        "b2": jnp.zeros((Lc, 1, 4 * Hf), jnp.float32),
        "bn2g": jnp.ones((Lc, 1, Hf), jnp.float32),
        "bn2b": jnp.zeros((Lc, 1, Hf), jnp.float32),
        "fc_w": _uniform(keys[-1], (Hf, n_components), fc_scale),
        "fc_b": jnp.zeros((1, n_components), jnp.float32),
    }


# ----------------------------------------------------------------------------- #
# Forward pass (mirrors GraphConvNet.forward)
# ----------------------------------------------------------------------------- #
@jax.jit
def graphconvnet_forward(params, x, E_start, E_end):
    # x = x.view(x.shape[0], -1) -> flatten node features
    x = x.reshape(x.shape[0], -1).astype(jnp.float32)
    Hmax = params["w1"].shape[1]
    if x.shape[1] < Hmax:
        x = jnp.pad(x, ((0, 0), (0, Hmax - x.shape[1])))   # matches zero-padded w1 rows
    es = E_start.astype(jnp.float32)                       # (E, V)
    ee = E_end.astype(jnp.float32)                         # (E, V)
    eet = jnp.transpose(E_end).astype(jnp.float32)         # (V, E), pre-transposed once
    return gnn_forward_fused(x, es, ee, eet, params)


# ----------------------------------------------------------------------------- #
if __name__ == "__main__":
    # net_parameters: D=8, H=16, L=4 (-> 2 gnn cells), n_components=2
    D, H, L, n_components = 8, 16, 4, 2
    V, E = 16, 32                          # nodes, edges

    key = jax.random.PRNGKey(0)
    k_param, k_x, k_s, k_e = jax.random.split(key, 4)

    params = init_graphconvnet_params(k_param, D, H, L, n_components)

    # G.inputs: node signals, shape (V, 2, 4) -> flattened to (V, D) in forward
    x = jax.random.normal(k_x, (V, 2, 4), jnp.float32)

    # dense incidence matrices: one-hot start / end vertex per edge
    start_idx = jax.random.randint(k_s, (E,), 0, V)
    end_idx = jax.random.randint(k_e, (E,), 0, V)
    E_start = jax.nn.one_hot(start_idx, V, dtype=jnp.float32)   # (E, V)
    E_end = jax.nn.one_hot(end_idx, V, dtype=jnp.float32)       # (E, V)

    out = graphconvnet_forward(params, x, E_start, E_end)
    jax.block_until_ready(out)
    assert out.shape == (V, n_components), out.shape
    assert bool(jnp.all(jnp.isfinite(out)))
    print("KERNEL_OK")
</pallas_src>

<mosaic_0001>
module attributes {stable_mosaic.version = 11 : i64} {
  func.func @fused_gnn_kernel(%arg0: i32, %arg1: memref<16x16xf32, #tpu.memory_space<vmem>>, %arg2: memref<32x16xf32, #tpu.memory_space<vmem>>, %arg3: memref<32x16xf32, #tpu.memory_space<vmem>>, %arg4: memref<16x32xf32, #tpu.memory_space<vmem>>, %arg5: memref<1x16x80xf32, #tpu.memory_space<vmem>>, %arg6: memref<1x1x80xf32, #tpu.memory_space<vmem>>, %arg7: memref<1x1x16xf32, #tpu.memory_space<vmem>>, %arg8: memref<1x1x16xf32, #tpu.memory_space<vmem>>, %arg9: memref<1x16x64xf32, #tpu.memory_space<vmem>>, %arg10: memref<1x1x64xf32, #tpu.memory_space<vmem>>, %arg11: memref<1x1x16xf32, #tpu.memory_space<vmem>>, %arg12: memref<1x1x16xf32, #tpu.memory_space<vmem>>, %arg13: memref<16x2xf32, #tpu.memory_space<vmem>>, %arg14: memref<1x2xf32, #tpu.memory_space<vmem>>, %arg15: memref<16x2xf32, #tpu.memory_space<vmem>>, %arg16: memref<16x16xf32, #tpu.memory_space<vmem>>) attributes {dimension_semantics = [#tpu.dimension_semantics<arbitrary>], iteration_bounds = array<i64: 2>, scalar_prefetch = 0 : i64, scratch_operands = 1 : i64, tpu.core_type = #tpu.core_type<tc>, window_params = [{pipeline_mode = #tpu.pipeline_mode<synchronous>, transform_indices = @transform_0, window_bounds = array<i64: 16, 16>}, {pipeline_mode = #tpu.pipeline_mode<synchronous>, transform_indices = @transform_1, window_bounds = array<i64: 32, 16>}, {pipeline_mode = #tpu.pipeline_mode<synchronous>, transform_indices = @transform_2, window_bounds = array<i64: 32, 16>}, {pipeline_mode = #tpu.pipeline_mode<synchronous>, transform_indices = @transform_3, window_bounds = array<i64: 16, 32>}, {transform_indices = @transform_4, window_bounds = array<i64: 1, 16, 80>}, {transform_indices = @transform_5, window_bounds = array<i64: 1, 1, 80>}, {transform_indices = @transform_6, window_bounds = array<i64: 1, 1, 16>}, {transform_indices = @transform_7, window_bounds = array<i64: 1, 1, 16>}, {transform_indices = @transform_8, window_bounds = array<i64: 1, 16, 64>}, {transform_indices = @transform_9, window_bounds = array<i64: 1, 1, 64>}, {transform_indices = @transform_10, window_bounds = array<i64: 1, 1, 16>}, {transform_indices = @transform_11, window_bounds = array<i64: 1, 1, 16>}, {pipeline_mode = #tpu.pipeline_mode<synchronous>, transform_indices = @transform_12, window_bounds = array<i64: 16, 2>}, {pipeline_mode = #tpu.pipeline_mode<synchronous>, transform_indices = @transform_13, window_bounds = array<i64: 1, 2>}, {pipeline_mode = #tpu.pipeline_mode<synchronous>, transform_indices = @transform_14, window_bounds = array<i64: 16, 2>}]} {
    %c0_i32 = arith.constant 0 : i32
    %0 = arith.cmpi eq, %arg0, %c0_i32 : i32
    %1 = arith.extui %0 : i1 to i32
    %c0_i32_0 = arith.constant 0 : i32
    %2 = arith.cmpi ne, %1, %c0_i32_0 : i32
    scf.if %2 {
      %c0_58 = arith.constant 0 : index
      %c0_59 = arith.constant 0 : index
      %123 = vector.load %arg1[%c0_58, %c0_59] : memref<16x16xf32, #tpu.memory_space<vmem>>, vector<16x16xf32>
      %c0_60 = arith.constant 0 : index
      %c0_61 = arith.constant 0 : index
      %124 = vector.load %arg16[%c0_60, %c0_61] : memref<16x16xf32, #tpu.memory_space<vmem>>, vector<16x16xf32>
      tpu.vector_store %arg16[%c0_60, %c0_61], %123 {strides = array<i32>} : memref<16x16xf32, #tpu.memory_space<vmem>>, vector<16x16xf32>,
    } else {
    }
    %c0 = arith.constant 0 : index
    %c0_1 = arith.constant 0 : index
    %3 = vector.load %arg16[%c0, %c0_1] : memref<16x16xf32, #tpu.memory_space<vmem>>, vector<16x16xf32>
    %c0_2 = arith.constant 0 : index
    %c0_3 = arith.constant 0 : index
    %4 = vector.load %arg2[%c0_2, %c0_3] : memref<32x16xf32, #tpu.memory_space<vmem>>, vector<32x16xf32>
    %c0_4 = arith.constant 0 : index
    %c0_5 = arith.constant 0 : index
    %5 = vector.load %arg3[%c0_4, %c0_5] : memref<32x16xf32, #tpu.memory_space<vmem>>, vector<32x16xf32>
    %c0_6 = arith.constant 0 : index
    %c0_7 = arith.constant 0 : index
    %6 = vector.load %arg4[%c0_6, %c0_7] : memref<16x32xf32, #tpu.memory_space<vmem>>, vector<16x32xf32>
    %c0_8 = arith.constant 0 : index
    %c0_9 = arith.constant 0 : index
    %c0_10 = arith.constant 0 : index
    %7 = vector.load %arg5[%c0_8, %c0_9, %c0_10] : memref<1x16x80xf32, #tpu.memory_space<vmem>>, vector<1x16x80xf32>
    %8 = vector.shape_cast %7 : vector<1x16x80xf32> to vector<16x80xf32>
    %cst = arith.constant dense<0.000000e+00> : vector<16x80xf32>
    %9 = tpu.matmul %3, %8, %cst {dimension_numbers = #tpu.dot_dimension_numbers<[1], [0], [0], [1], [0, 0, 1, 1], [], []>} : vector<16x16xf32>, vector<16x80xf32>, vector<16x80xf32> -> vector<16x80xf32>
    %c0_11 = arith.constant 0 : index
    %c0_12 = arith.constant 0 : index
    %c0_13 = arith.constant 0 : index
    %10 = vector.load %arg6[%c0_11, %c0_12, %c0_13] : memref<1x1x80xf32, #tpu.memory_space<vmem>>, vector<1x1x80xf32>
    %11 = vector.shape_cast %10 : vector<1x1x80xf32> to vector<1x80xf32>
    %12 = vector.broadcast %11 : vector<1x80xf32> to vector<16x80xf32>
    %13 = arith.addf %9, %12 : vector<16x80xf32>
    %14 = vector.extract_strided_slice %13 {offsets = [0, 0], sizes = [16, 16], strides = [1, 1]} : vector<16x80xf32> to vector<16x16xf32>
    %15 = vector.extract_strided_slice %13 {offsets = [0, 16], sizes = [16, 16], strides = [1, 1]} : vector<16x80xf32> to vector<16x16xf32>
    %16 = vector.extract_strided_slice %13 {offsets = [0, 32], sizes = [16, 16], strides = [1, 1]} : vector<16x80xf32> to vector<16x16xf32>
    %17 = vector.extract_strided_slice %13 {offsets = [0, 48], sizes = [16, 16], strides = [1, 1]} : vector<16x80xf32> to vector<16x16xf32>
    %18 = tpu.concatenate %15, %17 in 1 : vector<16x16xf32>, vector<16x16xf32> -> vector<16x32xf32>
    %cst_14 = arith.constant dense<0.000000e+00> : vector<32x32xf32>
    %19 = tpu.matmul %4, %18, %cst_14 {dimension_numbers = #tpu.dot_dimension_numbers<[1], [0], [0], [1], [0, 0, 1, 1], [], []>} : vector<32x16xf32>, vector<16x32xf32>, vector<32x32xf32> -> vector<32x32xf32>
    %20 = vector.extract_strided_slice %19 {offsets = [0, 0], sizes = [32, 16], strides = [1, 1]} : vector<32x32xf32> to vector<32x16xf32>
    %21 = vector.extract_strided_slice %19 {offsets = [0, 16], sizes = [32, 16], strides = [1, 1]} : vector<32x32xf32> to vector<32x16xf32>
    %cst_15 = arith.constant dense<0.000000e+00> : vector<32x16xf32>
    %22 = tpu.matmul %5, %16, %cst_15 {dimension_numbers = #tpu.dot_dimension_numbers<[1], [0], [0], [1], [0, 0, 1, 1], [], []>} : vector<32x16xf32>, vector<16x16xf32>, vector<32x16xf32> -> vector<32x16xf32>
    %23 = arith.addf %22, %21 : vector<32x16xf32>
    %24 = arith.negf %23 : vector<32x16xf32>
    %25 = math.exp %24 : vector<32x16xf32>
    %cst_16 = arith.constant 1.000000e+00 : f32
    %26 = vector.broadcast %cst_16 : f32 to vector<32x16xf32>
    %27 = arith.addf %26, %25 : vector<32x16xf32>
    %28 = arith.divf %26, %27 : vector<32x16xf32>
    %29 = arith.mulf %28, %20 : vector<32x16xf32>
    %cst_17 = arith.constant dense<0.000000e+00> : vector<16x16xf32>
    %30 = tpu.matmul %6, %29, %cst_17 {dimension_numbers = #tpu.dot_dimension_numbers<[1], [0], [0], [1], [0, 0, 1, 1], [], []>} : vector<16x32xf32>, vector<32x16xf32>, vector<16x16xf32> -> vector<16x16xf32>
    %31 = arith.addf %14, %30 : vector<16x16xf32>
    %c0_18 = arith.constant 0 : index
    %c0_19 = arith.constant 0 : index
    %c0_20 = arith.constant 0 : index
    %32 = vector.load %arg7[%c0_18, %c0_19, %c0_20] : memref<1x1x16xf32, #tpu.memory_space<vmem>>, vector<1x1x16xf32>
    %33 = vector.shape_cast %32 : vector<1x1x16xf32> to vector<1x16xf32>
    %c0_21 = arith.constant 0 : index
    %c0_22 = arith.constant 0 : index
    %c0_23 = arith.constant 0 : index
    %34 = vector.load %arg8[%c0_21, %c0_22, %c0_23] : memref<1x1x16xf32, #tpu.memory_space<vmem>>, vector<1x1x16xf32>
    %35 = vector.shape_cast %34 : vector<1x1x16xf32> to vector<1x16xf32>
    %cst_24 = arith.constant dense<0.000000e+00> : vector<16xf32>
    %36 = vector.multi_reduction <add>, %31, %cst_24 [0] : vector<16x16xf32> to vector<16xf32>
    %37 = vector.shape_cast %36 : vector<16xf32> to vector<1x16xf32>
    %cst_25 = arith.constant 1.600000e+01 : f32
    %38 = vector.broadcast %cst_25 : f32 to vector<1x16xf32>
    %39 = arith.divf %37, %38 : vector<1x16xf32>
    %40 = arith.mulf %31, %31 : vector<16x16xf32>
    %cst_26 = arith.constant dense<0.000000e+00> : vector<16xf32>
    %41 = vector.multi_reduction <add>, %40, %cst_26 [0] : vector<16x16xf32> to vector<16xf32>
    %42 = vector.shape_cast %41 : vector<16xf32> to vector<1x16xf32>
    %cst_27 = arith.constant 1.600000e+01 : f32
    %43 = vector.broadcast %cst_27 : f32 to vector<1x16xf32>
    %44 = arith.divf %42, %43 : vector<1x16xf32>
    %45 = arith.mulf %39, %39 : vector<1x16xf32>
    %46 = arith.subf %44, %45 : vector<1x16xf32>
    %cst_28 = arith.constant 0.000000e+00 : f32
    %47 = vector.broadcast %cst_28 : f32 to vector<1x16xf32>
    %48 = arith.maximumf %46, %47 : vector<1x16xf32>
    %49 = vector.broadcast %39 : vector<1x16xf32> to vector<16x16xf32>
    %50 = arith.subf %31, %49 : vector<16x16xf32>
    %cst_29 = arith.constant 9.99999974E-6 : f32
    %51 = vector.broadcast %cst_29 : f32 to vector<1x16xf32>
    %52 = arith.addf %48, %51 : vector<1x16xf32>
    %53 = math.rsqrt %52 : vector<1x16xf32>
    %54 = vector.broadcast %53 : vector<1x16xf32> to vector<16x16xf32>
    %55 = arith.mulf %50, %54 : vector<16x16xf32>
    %56 = vector.broadcast %33 : vector<1x16xf32> to vector<16x16xf32>
    %57 = arith.mulf %55, %56 : vector<16x16xf32>
    %58 = vector.broadcast %35 : vector<1x16xf32> to vector<16x16xf32>
    %59 = arith.addf %57, %58 : vector<16x16xf32>
    %cst_30 = arith.constant 0.000000e+00 : f32
    %60 = vector.broadcast %cst_30 : f32 to vector<16x16xf32>
    %61 = arith.maximumf %59, %60 : vector<16x16xf32>
    %62 = vector.extract_strided_slice %13 {offsets = [0, 64], sizes = [16, 16], strides = [1, 1]} : vector<16x80xf32> to vector<16x16xf32>
    %c0_31 = arith.constant 0 : index
    %c0_32 = arith.constant 0 : index
    %c0_33 = arith.constant 0 : index
    %63 = vector.load %arg9[%c0_31, %c0_32, %c0_33] : memref<1x16x64xf32, #tpu.memory_space<vmem>>, vector<1x16x64xf32>
    %64 = vector.shape_cast %63 : vector<1x16x64xf32> to vector<16x64xf32>
    %cst_34 = arith.constant dense<0.000000e+00> : vector<16x64xf32>
    %65 = tpu.matmul %61, %64, %cst_34 {dimension_numbers = #tpu.dot_dimension_numbers<[1], [0], [0], [1], [0, 0, 1, 1], [], []>} : vector<16x16xf32>, vector<16x64xf32>, vector<16x64xf32> -> vector<16x64xf32>
    %c0_35 = arith.constant 0 : index
    %c0_36 = arith.constant 0 : index
    %c0_37 = arith.constant 0 : index
    %66 = vector.load %arg10[%c0_35, %c0_36, %c0_37] : memref<1x1x64xf32, #tpu.memory_space<vmem>>, vector<1x1x64xf32>
    %67 = vector.shape_cast %66 : vector<1x1x64xf32> to vector<1x64xf32>
    %68 = vector.broadcast %67 : vector<1x64xf32> to vector<16x64xf32>
    %69 = arith.addf %65, %68 : vector<16x64xf32>
    %70 = vector.extract_strided_slice %69 {offsets = [0, 0], sizes = [16, 16], strides = [1, 1]} : vector<16x64xf32> to vector<16x16xf32>
    %71 = vector.extract_strided_slice %69 {offsets = [0, 16], sizes = [16, 16], strides = [1, 1]} : vector<16x64xf32> to vector<16x16xf32>
    %72 = vector.extract_strided_slice %69 {offsets = [0, 32], sizes = [16, 16], strides = [1, 1]} : vector<16x64xf32> to vector<16x16xf32>
    %73 = vector.extract_strided_slice %69 {offsets = [0, 48], sizes = [16, 16], strides = [1, 1]} : vector<16x64xf32> to vector<16x16xf32>
    %74 = tpu.concatenate %71, %73 in 1 : vector<16x16xf32>, vector<16x16xf32> -> vector<16x32xf32>
    %cst_38 = arith.constant dense<0.000000e+00> : vector<32x32xf32>
    %75 = tpu.matmul %4, %74, %cst_38 {dimension_numbers = #tpu.dot_dimension_numbers<[1], [0], [0], [1], [0, 0, 1, 1], [], []>} : vector<32x16xf32>, vector<16x32xf32>, vector<32x32xf32> -> vector<32x32xf32>
    %76 = vector.extract_strided_slice %75 {offsets = [0, 0], sizes = [32, 16], strides = [1, 1]} : vector<32x32xf32> to vector<32x16xf32>
    %77 = vector.extract_strided_slice %75 {offsets = [0, 16], sizes = [32, 16], strides = [1, 1]} : vector<32x32xf32> to vector<32x16xf32>
    %cst_39 = arith.constant dense<0.000000e+00> : vector<32x16xf32>
    %78 = tpu.matmul %5, %72, %cst_39 {dimension_numbers = #tpu.dot_dimension_numbers<[1], [0], [0], [1], [0, 0, 1, 1], [], []>} : vector<32x16xf32>, vector<16x16xf32>, vector<32x16xf32> -> vector<32x16xf32>
    %79 = arith.addf %78, %77 : vector<32x16xf32>
    %80 = arith.negf %79 : vector<32x16xf32>
    %81 = math.exp %80 : vector<32x16xf32>
    %cst_40 = arith.constant 1.000000e+00 : f32
    %82 = vector.broadcast %cst_40 : f32 to vector<32x16xf32>
    %83 = arith.addf %82, %81 : vector<32x16xf32>
    %84 = arith.divf %82, %83 : vector<32x16xf32>
    %85 = arith.mulf %84, %76 : vector<32x16xf32>
    %cst_41 = arith.constant dense<0.000000e+00> : vector<16x16xf32>
    %86 = tpu.matmul %6, %85, %cst_41 {dimension_numbers = #tpu.dot_dimension_numbers<[1], [0], [0], [1], [0, 0, 1, 1], [], []>} : vector<16x32xf32>, vector<32x16xf32>, vector<16x16xf32> -> vector<16x16xf32>
    %87 = arith.addf %70, %86 : vector<16x16xf32>
    %c0_42 = arith.constant 0 : index
    %c0_43 = arith.constant 0 : index
    %c0_44 = arith.constant 0 : index
    %88 = vector.load %arg11[%c0_42, %c0_43, %c0_44] : memref<1x1x16xf32, #tpu.memory_space<vmem>>, vector<1x1x16xf32>
    %89 = vector.shape_cast %88 : vector<1x1x16xf32> to vector<1x16xf32>
    %c0_45 = arith.constant 0 : index
    %c0_46 = arith.constant 0 : index
    %c0_47 = arith.constant 0 : index
    %90 = vector.load %arg12[%c0_45, %c0_46, %c0_47] : memref<1x1x16xf32, #tpu.memory_space<vmem>>, vector<1x1x16xf32>
    %91 = vector.shape_cast %90 : vector<1x1x16xf32> to vector<1x16xf32>
    %cst_48 = arith.constant dense<0.000000e+00> : vector<16xf32>
    %92 = vector.multi_reduction <add>, %87, %cst_48 [0] : vector<16x16xf32> to vector<16xf32>
    %93 = vector.shape_cast %92 : vector<16xf32> to vector<1x16xf32>
    %cst_49 = arith.constant 1.600000e+01 : f32
    %94 = vector.broadcast %cst_49 : f32 to vector<1x16xf32>
    %95 = arith.divf %93, %94 : vector<1x16xf32>
    %96 = arith.mulf %87, %87 : vector<16x16xf32>
    %cst_50 = arith.constant dense<0.000000e+00> : vector<16xf32>
    %97 = vector.multi_reduction <add>, %96, %cst_50 [0] : vector<16x16xf32> to vector<16xf32>
    %98 = vector.shape_cast %97 : vector<16xf32> to vector<1x16xf32>
    %cst_51 = arith.constant 1.600000e+01 : f32
    %99 = vector.broadcast %cst_51 : f32 to vector<1x16xf32>
    %100 = arith.divf %98, %99 : vector<1x16xf32>
    %101 = arith.mulf %95, %95 : vector<1x16xf32>
    %102 = arith.subf %100, %101 : vector<1x16xf32>
    %cst_52 = arith.constant 0.000000e+00 : f32
    %103 = vector.broadcast %cst_52 : f32 to vector<1x16xf32>
    %104 = arith.maximumf %102, %103 : vector<1x16xf32>
    %105 = vector.broadcast %95 : vector<1x16xf32> to vector<16x16xf32>
    %106 = arith.subf %87, %105 : vector<16x16xf32>
    %cst_53 = arith.constant 9.99999974E-6 : f32
    %107 = vector.broadcast %cst_53 : f32 to vector<1x16xf32>
    %108 = arith.addf %104, %107 : vector<1x16xf32>
    %109 = math.rsqrt %108 : vector<1x16xf32>
    %110 = vector.broadcast %109 : vector<1x16xf32> to vector<16x16xf32>
    %111 = arith.mulf %106, %110 : vector<16x16xf32>
    %112 = vector.broadcast %89 : vector<1x16xf32> to vector<16x16xf32>
    %113 = arith.mulf %111, %112 : vector<16x16xf32>
    %114 = vector.broadcast %91 : vector<1x16xf32> to vector<16x16xf32>
    %115 = arith.addf %113, %114 : vector<16x16xf32>
    %cst_54 = arith.constant 0.000000e+00 : f32
    %116 = vector.broadcast %cst_54 : f32 to vector<16x16xf32>
    %117 = arith.maximumf %115, %116 : vector<16x16xf32>
    %118 = arith.addf %117, %62 : vector<16x16xf32>
    %c0_55 = arith.constant 0 : index
    %c0_56 = arith.constant 0 : index
    %119 = vector.load %arg16[%c0_55, %c0_56] : memref<16x16xf32, #tpu.memory_space<vmem>>, vector<16x16xf32>
    tpu.vector_store %arg16[%c0_55, %c0_56], %118 {strides = array<i32>} : memref<16x16xf32, #tpu.memory_space<vmem>>, vector<16x16xf32>,
    %c1_i32 = arith.constant 1 : i32
    %120 = arith.cmpi eq, %arg0, %c1_i32 : i32
    %121 = arith.extui %120 : i1 to i32
    %c0_i32_57 = arith.constant 0 : i32
    %122 = arith.cmpi ne, %121, %c0_i32_57 : i32
    scf.if %122 {
      %c0_58 = arith.constant 0 : index
      %c0_59 = arith.constant 0 : index
      %123 = vector.load %arg13[%c0_58, %c0_59] : memref<16x2xf32, #tpu.memory_space<vmem>>, vector<16x2xf32>
      %cst_60 = arith.constant dense<0.000000e+00> : vector<16x2xf32>
      %124 = tpu.matmul %118, %123, %cst_60 {dimension_numbers = #tpu.dot_dimension_numbers<[1], [0], [0], [1], [0, 0, 1, 1], [], []>} : vector<16x16xf32>, vector<16x2xf32>, vector<16x2xf32> -> vector<16x2xf32>
      %c0_61 = arith.constant 0 : index
      %c0_62 = arith.constant 0 : index
      %125 = vector.load %arg14[%c0_61, %c0_62] : memref<1x2xf32, #tpu.memory_space<vmem>>, vector<1x2xf32>
      %126 = vector.broadcast %125 : vector<1x2xf32> to vector<16x2xf32>
      %127 = arith.addf %124, %126 : vector<16x2xf32>
      %c0_63 = arith.constant 0 : index
      %c0_64 = arith.constant 0 : index
      %128 = vector.load %arg15[%c0_63, %c0_64] : memref<16x2xf32, #tpu.memory_space<vmem>>, vector<16x2xf32>
      tpu.vector_store %arg15[%c0_63, %c0_64], %127 {strides = array<i32>} : memref<16x2xf32, #tpu.memory_space<vmem>>, vector<16x2xf32>,
    } else {
    }
    return
  }
  func.func @transform_0(%arg0: i32) -> (i32, i32) {
    %c0_i32 = arith.constant 0 : i32
    %c0_i32_0 = arith.constant 0 : i32
    %c0_i32_1 = arith.constant 0 : i32
    return %c0_i32, %c0_i32_0 : i32, i32
  }
  func.func @transform_1(%arg0: i32) -> (i32, i32) {
    %c0_i32 = arith.constant 0 : i32
    %c0_i32_0 = arith.constant 0 : i32
    %c0_i32_1 = arith.constant 0 : i32
    return %c0_i32, %c0_i32_0 : i32, i32
  }
  func.func @transform_2(%arg0: i32) -> (i32, i32) {
    %c0_i32 = arith.constant 0 : i32
    %c0_i32_0 = arith.constant 0 : i32
    %c0_i32_1 = arith.constant 0 : i32
    return %c0_i32, %c0_i32_0 : i32, i32
  }
  func.func @transform_3(%arg0: i32) -> (i32, i32) {
    %c0_i32 = arith.constant 0 : i32
    %c0_i32_0 = arith.constant 0 : i32
    %c0_i32_1 = arith.constant 0 : i32
    return %c0_i32, %c0_i32_0 : i32, i32
  }
  func.func @transform_4(%arg0: i32) -> (i32, i32, i32) {
    %c0_i32 = arith.constant 0 : i32
    %c0_i32_0 = arith.constant 0 : i32
    %c0_i32_1 = arith.constant 0 : i32
    return %arg0, %c0_i32, %c0_i32_0 : i32, i32, i32
  }
  func.func @transform_5(%arg0: i32) -> (i32, i32, i32) {
    %c0_i32 = arith.constant 0 : i32
    %c0_i32_0 = arith.constant 0 : i32
    %c0_i32_1 = arith.constant 0 : i32
    return %arg0, %c0_i32, %c0_i32_0 : i32, i32, i32
  }
  func.func @transform_6(%arg0: i32) -> (i32, i32, i32) {
    %c0_i32 = arith.constant 0 : i32
    %c0_i32_0 = arith.constant 0 : i32
    %c0_i32_1 = arith.constant 0 : i32
    return %arg0, %c0_i32, %c0_i32_0 : i32, i32, i32
  }
  func.func @transform_7(%arg0: i32) -> (i32, i32, i32) {
    %c0_i32 = arith.constant 0 : i32
    %c0_i32_0 = arith.constant 0 : i32
    %c0_i32_1 = arith.constant 0 : i32
    return %arg0, %c0_i32, %c0_i32_0 : i32, i32, i32
  }
  func.func @transform_8(%arg0: i32) -> (i32, i32, i32) {
    %c0_i32 = arith.constant 0 : i32
    %c0_i32_0 = arith.constant 0 : i32
    %c0_i32_1 = arith.constant 0 : i32
    return %arg0, %c0_i32, %c0_i32_0 : i32, i32, i32
  }
  func.func @transform_9(%arg0: i32) -> (i32, i32, i32) {
    %c0_i32 = arith.constant 0 : i32
    %c0_i32_0 = arith.constant 0 : i32
    %c0_i32_1 = arith.constant 0 : i32
    return %arg0, %c0_i32, %c0_i32_0 : i32, i32, i32
  }
  func.func @transform_10(%arg0: i32) -> (i32, i32, i32) {
    %c0_i32 = arith.constant 0 : i32
    %c0_i32_0 = arith.constant 0 : i32
    %c0_i32_1 = arith.constant 0 : i32
    return %arg0, %c0_i32, %c0_i32_0 : i32, i32, i32
  }
  func.func @transform_11(%arg0: i32) -> (i32, i32, i32) {
    %c0_i32 = arith.constant 0 : i32
    %c0_i32_0 = arith.constant 0 : i32
    %c0_i32_1 = arith.constant 0 : i32
    return %arg0, %c0_i32, %c0_i32_0 : i32, i32, i32
  }
  func.func @transform_12(%arg0: i32) -> (i32, i32) {
    %c0_i32 = arith.constant 0 : i32
    %c0_i32_0 = arith.constant 0 : i32
    %c0_i32_1 = arith.constant 0 : i32
    return %c0_i32, %c0_i32_0 : i32, i32
  }
  func.func @transform_13(%arg0: i32) -> (i32, i32) {
    %c0_i32 = arith.constant 0 : i32
    %c0_i32_0 = arith.constant 0 : i32
    %c0_i32_1 = arith.constant 0 : i32
    return %c0_i32, %c0_i32_0 : i32, i32
  }
  func.func @transform_14(%arg0: i32) -> (i32, i32) {
    %c0_i32 = arith.constant 0 : i32
    %c0_i32_0 = arith.constant 0 : i32
    %c0_i32_1 = arith.constant 0 : i32
    return %c0_i32, %c0_i32_0 : i32, i32
  }
}

</mosaic_0001>

<bundles_post_ra>
// kernel: graphconvnet_forward.1
= control target key start
LH: loop header
LB: loop body
LE: loop exit
PB: predicated region body
PF: predicated region fallthrough
CT: control target
= control target key end

     0   :  { %s1545_s29 = smov 0   ;;  %s1841_s0 = inlined_call_operand.vmem [shape: f32[16,16], index: 0, kind: input, shape index: {}]   ;;  %s1842_s1 = inlined_call_operand.vmem [shape: f32[32,16], index: 1, kind: input, shape index: {}]   ;;  %s1843_s2 = inlined_call_operand.vmem [shape: f32[32,16], index: 2, kind: input, shape index: {}]   ;;  %s1844_s3 = inlined_call_operand.vmem [shape: f32[16,32], index: 3, kind: input, shape index: {}]   ;;  %s1845_s4 = inlined_call_operand.vmem [shape: f32[2,16,80], index: 4, kind: input, shape index: {}]   ;;  %s1846_s5 = inlined_call_operand.vmem [shape: f32[2,1,80], index: 5, kind: input, shape index: {}]   ;;  %s1847_s6 = inlined_call_operand.vmem [shape: f32[2,1,16], index: 6, kind: input, shape index: {}]   ;;  %s1848_s7 = inlined_call_operand.vmem [shape: f32[2,1,16], index: 7, kind: input, shape index: {}]   ;;  %s1849_s8 = inlined_call_operand.vmem [shape: f32[2,16,64], index: 8, kind: input, shape index: {}]   ;;  %s1850_s9 = inlined_call_operand.vmem [shape: f32[2,1,64], index: 9, kind: input, shape index: {}]   ;;  %s1851_s10 = inlined_call_operand.vmem [shape: f32[2,1,16], index: 10, kind: input, shape index: {}]   ;;  %s1852_s11 = inlined_call_operand.vmem [shape: f32[2,1,16], index: 11, kind: input, shape index: {}]   ;;  %s1853_s12 = inlined_call_operand.vmem [shape: f32[16,2], index: 12, kind: input, shape index: {}]   ;;  %s1854_s13 = inlined_call_operand.vmem [shape: f32[1,2], index: 13, kind: input, shape index: {}]   ;;  %s1855_s14 = inlined_call_operand.vmem [shape: f32[16,2], index: 14, kind: output, shape index: {}]  }
   0x1   :  { %1859 = sst [smem:[#allocation4_spill]] %s1845_s4 }
   0x2   :  { %1860 = sst [smem:[#allocation5_spill]] %s1846_s5 }
   0x3   :  { %1861 = sst [smem:[#allocation6_spill]] %s1853_s12 }
   0x4   :  { %1862 = sst [smem:[#allocation7_spill]] %s1854_s13 }
   0x5   :  { %1863 = sst [smem:[#allocation8_spill]] %s1855_s14 }
   0x6 LB: > { %1864 = sst [smem:[#allocation3_spill]] %s1464_s29  ;;  %s1551_s30 = sadd.s32 4294967295, %s1464_s29   ;;  %s1464_s29 = sphi %s1545_s29, %s24_s29  }
   0x7   : > { %p1334_p0 = scmp.ge.s32.totalorder %s1464_s29, 1  ;;  %p465_p1 = scmp.lt.s32.totalorder %s1464_s29, 3 }
   0x9   : > { %p466_p2 = pnand %p1334_p0, %p465_p1 }
   0xa   : > { %p529_p3 = scmp.lt.s32.totalorder (!%p466_p2), %s1551_s30, 1  ;;  %s1865_s5 = sld [smem:[#allocation5_spill]] (!%p466_p2) }
   0xb   : > { %469 = sbr.rel (%p466_p2) target bundleno = 1696 (0x6a0), region = 76  ;;  %s1866_s4 = sld [smem:[#allocation4_spill]] (!%p466_p2) }
   0xc   : > { %p1339_p4 = scmp.ne.s32.totalorder (!%p466_p2), %s1551_s30, 0 }
  0x10   : > { %s1557_s15 = scalar_select %p529_p3, %s1551_s30, 1 }
  0x12   : > { %s1377_s16 = sshll.u32 %s1557_s15, 4  ;;  %s536_s19 = scalar_lea.vmem %s1865_s5, %s1557_s15 }
  0x13   : > { %s533_s22 = scalar_lea.vmem %s1866_s4, %s1377_s16  ;;  %s539_s25 = scalar_lea.vmem %s1847_s6, %s1557_s15 }
  0x14   : > { %s542_s28 = scalar_lea.vmem %s1848_s7, %s1557_s15  ;;  %s1578_s13 = scalar_lea.vmem %s1849_s8, %s1377_s16 }
  0x15   : > { %s550_s18 = scalar_lea.vmem %s1850_s9, %s1557_s15  ;;  %s553_s21 = scalar_lea.vmem %s1851_s10, %s1557_s15 }
  0x16   : > { %s556_s24 = scalar_lea.vmem %s1852_s11, %s1557_s15  ;;  %560 = sbr.rel (%p1339_p4) target bundleno = 30 (0x1e), region = 80 }
  0x1b   : > { %v561_v0 = vld [vmem:[%s1841_s0] sm:$0xff]  ;;  %vm563_vm0 = vcmask 130048   ;;  %v562_v1 = vld [vmem:[%s1841_s0 + $0x8] sm:$0xff] }
  0x1c   : > { %564 = vst.msk [vmem:[#allocation2] sm:$0xff] %vm563_vm0, %v561_v0 }
  0x1d   : > { %565 = vst.msk [vmem:[#allocation2 + $0x8] sm:$0xff] %vm563_vm0, %v562_v1 }
  0x1e PF: > { %v579_v2 = vld [vmem:[%s533_s22 + $0x8] sm:$0xff]  ;;  %v578_v3 = vld [vmem:[%s533_s22] sm:$0xff]  ;;  %vm584_vm1 = vcmask 130048   ;;  %s1466_s4 = smov 112   ;;  %s1467_s5 = smov 96   ;;  %v1642_v24 = vld [vmem:[%s1842_s1 + $0x10] sm:$0xff] }
  0x1f   : > { %605 = vmatpush.msra.mxu2 %v579_v2  ;;  %v1413_v7 = vld [vmem:[%s536_s19] ss:$0 sm:$0xff]  ;;  %v1628_v22 = vld [vmem:[%s1843_s2 + $0x8] sm:$0xff]  ;;  %v1649_v25 = vld [vmem:[%s1842_s1 + $0x18] sm:$0xff]  ;;  %p1372_p5 = scmp.ne.s32.totalorder %s1551_s30, 1 }
  0x20   : > { %v1613_v19 = vld [vmem:[%s1843_s2] sm:$0xff]  ;;  %v1633_v23 = vld [vmem:[%s1842_s1 + $0x8] sm:$0xff]  ;;  %v1656_v26 = vld [vmem:[%s1843_s2 + $0x10] sm:$0xff]  ;;  %s1872_s30 = sld [smem:[#allocation7_spill]] (!%p1372_p5) }
  0x21   : > { %606 = vmatpush.msra.mxu2 %v578_v3  ;;  %v1618_v20 = vld [vmem:[%s1842_s1] sm:$0xff]  ;;  %v1663_v27 = vld [vmem:[%s1843_s2 + $0x18] sm:$0xff] }
  0x23   : > { %v566_v4 = vld [vmem:[#allocation2] sm:$0xff] }
  0x24   : > { %1340 = vmatmul.msk.f32.vlgmr.msra.gmra.mxu2 %vm584_vm1, %v566_v4  ;;  %v567_v5 = vld [vmem:[#allocation2 + $0x8] sm:$0xff] }
  0x2c   : > { %1341 = vmatmul.msk.f32.gmra.mxu2 %vm584_vm1, %v567_v5 }
  0xa7   : > { %v608_v6 = vpop.f32.mrf.mxu2 }
  0xa8   : > { %v1601_v9 = vadd.f32 %v1413_v7, %v608_v6 }
  0xaf   : > { %v611_v8 = vpop.f32.mrf.mxu2 }
  0xb0   : > { %v1603_v10 = vadd.f32 %v1413_v7, %v611_v8 }
  0xb2   : > { %v1393_v11 = vpack.i.bf16 %v1601_v9, %v1603_v10 }
  0xb4   : > { %1394 = vrot.lane.b32.xlu0 %v1393_v11, %s1466_s4 }
  0xbc   : > { %1399 = vrot.lane.b32.xlu0 %v1393_v11, %s1467_s5 }
 0x126   : > { %v1395_v12 = vpop.permute.xlu0 %1394 }
 0x127   : > { %v1396_v14 = vunpack.i.l.bf16 %v1395_v12  ;;  %v1397_v17 = vunpack.i.h.bf16 %v1395_v12 }
 0x12e   : > { %v1400_v13 = vpop.permute.xlu0 %1399 }
 0x12f   : > { %v1401_v15 = vunpack.i.l.bf16 %v1400_v13  ;;  %v1402_v16 = vunpack.i.h.bf16 %v1400_v13 }
 0x131   : > { %713 = vmatpush.msrb.mxu2 %v1401_v15  ;;  %v629_v18 = vsel %vm584_vm1, %v1396_v14, %v1401_v15  ;;  %v628_v21 = vsel %vm584_vm1, %v1397_v17, %v1402_v16 }
 0x132   : > { %656 = vmatpush.msra.mxu1 %v629_v18 }
 0x133   : > { %714 = vmatpush.msrb.mxu2 %v1402_v16 }
 0x134   : > { %657 = vmatpush.msra.mxu1 %v628_v21  ;;  %1346 = vmatmul.msk.f32.vlgmr.msrb.gmra.mxu2 %vm584_vm1, %v1613_v19 }
 0x135   : > { %1342 = vmatmul.msk.f32.vlgmr.msra.gmra.mxu1 %vm584_vm1, %v1618_v20 }
 0x13c   : > { %1347 = vmatmul.msk.f32.gmra.mxu2 %vm584_vm1, %v1628_v22 }
 0x13d   : > { %1343 = vmatmul.msk.f32.gmra.mxu1 %vm584_vm1, %v1633_v23 }
 0x144   : > { %1348 = vmatmul.msk.f32.gmra.mxu2 %vm584_vm1, %v1656_v26 }
 0x145   : > { %1344 = vmatmul.msk.f32.gmra.mxu1 %vm584_vm1, %v1642_v24 }
 0x14c   : > { %1349 = vmatmul.msk.f32.gmra.mxu2 %vm584_vm1, %v1663_v27 }
 0x14d   : > { %1345 = vmatmul.msk.f32.gmra.mxu1 %vm584_vm1, %v1649_v25 }
 0x1b2   : > { %v1667_v28 = vpop.f32.mrf.mxu1 }
 0x1b7   : > { %v716_v32 = vpop.f32.mrf.mxu2 }
 0x1ba   : > { %v1669_v29 = vpop.f32.mrf.mxu1 }
 0x1bb   : > { %677 = vrot.lane.b32.xlu2 %v1669_v29, %s1466_s4 }
 0x1bf   : > { %v719_v34 = vpop.f32.mrf.mxu2 }
 0x1c2   : > { %v1673_v30 = vpop.f32.mrf.mxu1 }
 0x1c3   : > { %675 = vrot.lane.b32.xlu2 %v1667_v28, %s1466_s4 }
 0x1c7   : > { %v722_v36 = vpop.f32.mrf.mxu2 }
 0x1ca   : > { %v668_v31 = vpop.f32.mrf.mxu1 }
 0x1cb   : > { %681 = vrot.lane.b32.xlu1 %v668_v31, %s1466_s4 }
 0x1cf   : > { %v725_v41 = vpop.f32.mrf.mxu2 }
 0x1d3   : > { %679 = vrot.lane.b32.xlu1 %v1673_v30, %s1466_s4 }
 0x215   : > { %v678_v33 = vpop.permute.xlu2 %677 }
 0x216   : > { %v720_v37 = vadd.f32 %v719_v34, %v678_v33 }
 0x218   : > { %v1351_v39 = vmul.f32 -1.442695, %v720_v37 }
 0x21a   : > { %1419 = vpow2.f32 %v1351_v39 }
 0x21d   : > { %v676_v35 = vpop.permute.xlu2 %675 }
 0x21e   : > { %v717_v38 = vadd.f32 %v716_v32, %v676_v35 }
 0x220   : > { %v1350_v40 = vmul.f32 -1.442695, %v717_v38  ;;  %v1420_v44 = vpop.eup %1419 }
 0x221   : > { %v1680_v47 = vadd.f32 1.0, %v1420_v44 }
 0x222   : > { %1421 = vpow2.f32 %v1350_v40 }
 0x223   : > { %vm764_vm6 = vweird.f32 %v1680_v47  ;;  %v768_v18 = vand.u32 2147483647, %v1680_v47  ;;  %v770_v21 = vand.u32 2147483648, %v1680_v47 }
 0x225   : > { %v771_v40 = vor.u32 1.1754944e-38, %v770_v21  ;;  %vm769_vm0 = vcmp.eq.f32.partialorder %v768_v18, 8.507059e+37 }
 0x228   : > { %v1422_v46 = vpop.eup %1421 }
 0x229   : > { %v1682_v48 = vadd.f32 1.0, %v1422_v46 }
 0x22b   : > { %vm749_vm11 = vweird.f32 %v1682_v48  ;;  %v753_v38 = vand.u32 2147483647, %v1682_v48 }
 0x23d   : > { %v682_v42 = vpop.permute.xlu1 %681 }
 0x23e   : > { %v726_v43 = vadd.f32 %v725_v41, %v682_v42 }
 0x240   : > { %v1353_v45 = vmul.f32 -1.442695, %v726_v43 }
 0x242   : > { %1423 = vpow2.f32 %v1353_v45 }
 0x243   : > { %1425 = vrcp.f32 %v1680_v47 }
 0x244   : > { %1427 = vrcp.f32 %v1682_v48 }
 0x245   : > { %v680_v49 = vpop.permute.xlu1 %679 }
 0x246   : > { %v723_v50 = vadd.f32 %v722_v36, %v680_v49 }
 0x248   : > { %v1424_v51 = vpop.eup %1423  ;;  %v1352_v52 = vmul.f32 -1.442695, %v723_v50  ;;  %v1706_v50 = vld [vmem:[%s1844_s3] sm:$0xff] }
 0x249   : > { %v743_v53 = vadd.f32 1.0, %v1424_v51  ;;  %v1426_v54 = vpop.eup %1425 }
 0x24a   : > { %1429 = vpow2.f32 %v1352_v52  ;;  %v1428_v55 = vpop.eup %1427  ;;  %v760_v57 = vmul.f32 %v1426_v54, %v1680_v47  ;;  %vm765_vm7 = vweird.f32 %v1426_v54 }
 0x24b   : > { %1431 = vrcp.f32 %v743_v53  ;;  %v745_v61 = vmul.f32 %v1428_v55, %v1682_v48  ;;  %v800_v0 = vand.u32 2147483648, %v743_v53  ;;  %v798_v2 = vand.u32 2147483647, %v743_v53  ;;  %vm1691_vm10 = vmor %vm764_vm6, %vm765_vm7 }
 0x24c   : > { %v761_v63 = vsub.f32 1.0, %v760_v57  ;;  %vm794_vm3 = vweird.f32 %v743_v53  ;;  %vm750_vm8 = vweird.f32 %v1428_v55 }
 0x24d   : > { %v746_v3 = vsub.f32 1.0, %v745_v61  ;;  %v801_v7 = vor.u32 1.1754944e-38, %v800_v0  ;;  %vm799_vm5 = vcmp.eq.f32.partialorder %v798_v2, 8.507059e+37  ;;  %vm751_vm13 = vmor %vm749_vm11, %vm750_vm8 }
 0x24e   : > { %v762_v5 = vmul.f32 %v1426_v54, %v761_v63 }
 0x24f   : > { %v747_v12 = vmul.f32 %v1428_v55, %v746_v3 }
 0x250   : > { %v1430_v56 = vpop.eup %1429  ;;  %v763_v16 = vadd.f32 %v1426_v54, %v762_v5 }
 0x251   : > { %v1432_v58 = vpop.eup %1431  ;;  %v742_v59 = vadd.f32 1.0, %v1430_v56  ;;  %v748_v34 = vadd.f32 %v1428_v55, %v747_v12 }
 0x252   : > { %v790_v60 = vmul.f32 %v1432_v58, %v743_v53  ;;  %vm795_vm2 = vweird.f32 %v1432_v58  ;;  %v767_v37 = vsel %vm1691_vm10, %v1426_v54, %v763_v16 }
 0x253   : > { %1433 = vrcp.f32 %v742_v59  ;;  %vm796_vm4 = vmor %vm794_vm3, %vm795_vm2  ;;  %v785_v17 = vand.u32 2147483648, %v742_v59  ;;  %v783_v33 = vand.u32 2147483647, %v742_v59  ;;  %vm779_vm12 = vweird.f32 %v742_v59 }
 0x254   : > { %v791_v62 = vsub.f32 1.0, %v790_v60  ;;  %v752_v42 = vsel %vm751_vm13, %v1428_v55, %v748_v34  ;;  %v772_v44 = vsel %vm769_vm0, %v771_v40, %v767_v37  ;;  %vm754_vm2 = vcmp.eq.f32.partialorder %v753_v38, 8.507059e+37 }
 0x255   : > { %v786_v39 = vor.u32 1.1754944e-38, %v785_v17  ;;  %vm784_vm15 = vcmp.eq.f32.partialorder %v783_v33, 8.507059e+37  ;;  %v805_v49 = vmul.f32 %v772_v44, %v1669_v29  ;;  %vm808_vm3 = vcmask 261120   ;;  %v1414_v44 = vld [vmem:[%s539_s25] ss:$0 sm:$0xff] }
 0x256   : > { %v792_v1 = vmul.f32 %v1432_v58, %v791_v62  ;;  %v1468_v29 = vmov 16.0  }
 0x257   : > { %1435 = vrcp.f32 %v1468_v29 }
 0x258   : > { %v793_v4 = vadd.f32 %v1432_v58, %v792_v1 }
 0x259   : > { %v1434_v6 = vpop.eup %1433 }
 0x25a   : > { %v797_v8 = vsel %vm796_vm4, %v1432_v58, %v793_v4  ;;  %v775_v11 = vmul.f32 %v1434_v6, %v742_v59  ;;  %vm780_vm9 = vweird.f32 %v1434_v6 }
 0x25b   : > { %v802_v13 = vsel %vm799_vm5, %v801_v7, %v797_v8  ;;  %vm781_vm14 = vmor %vm779_vm12, %vm780_vm9 }
 0x25c   : > { %v807_v14 = vmul.f32 %v802_v13, %v668_v31  ;;  %v776_v15 = vsub.f32 1.0, %v775_v11  ;;  %v755_v31 = vand.u32 2147483648, %v1682_v48 }
 0x25d   : > { %v1436_v51 = vpop.eup %1435 }
 0x25e   : > { %827 = vmatpush.msra.mxu3 %v807_v14  ;;  %v777_v32 = vmul.f32 %v1434_v6, %v776_v15  ;;  %v756_v45 = vor.u32 1.1754944e-38, %v755_v31  ;;  %v852_v53 = vmul.f32 16.0, %v1436_v51  ;;  %vm856_vm4 = vweird.f32 %v1436_v51  ;;  %v902_v14 = vld [vmem:[%s1578_s13 + $0x8] sm:$0xff]  ;;  %v901_v15 = vld [vmem:[%s1578_s13] sm:$0xff]  ;;  %s1873_s13 = sld [smem:[#allocation8_spill]] (!%p1372_p5) }
 0x25f   : > { %927 = vmatpush.msra.mxu0 %v902_v14 }
 0x260   : > { %v778_v36 = vadd.f32 %v1434_v6, %v777_v32  ;;  %v757_v47 = vsel %vm754_vm2, %v756_v45, %v752_v42  ;;  %v853_v59 = vsub.f32 1.0, %v852_v53 }
 0x261   : > { %v804_v48 = vmul.f32 %v757_v47, %v1667_v28  ;;  %928 = vmatpush.msra.mxu0 %v901_v15 }
 0x262   : > { %v782_v41 = vsel %vm781_vm14, %v1434_v6, %v778_v36  ;;  %v854_v2 = vmul.f32 %v1436_v51, %v853_v59 }
 0x263   : > { %v787_v43 = vsel %vm784_vm15, %v786_v39, %v782_v41 }
 0x264   : > { %v806_v46 = vmul.f32 %v787_v43, %v1673_v30  ;;  %v1713_v30 = vld [vmem:[%s1844_s3 + $0x8] sm:$0xff]  ;;  %v855_v7 = vadd.f32 %v1436_v51, %v854_v2 }
 0x266   : > { %828 = vmatpush.msra.mxu3 %v806_v46  ;;  %v1725_v16 = vsel %vm856_vm4, %v1436_v51, %v855_v7 }
 0x268   : > { %829 = vmatpush.msra.mxu3 %v805_v49  ;;  %v1415_v49 = vld [vmem:[%s542_s28] ss:$0 sm:$0xff]  ;;  %s1469_s28 = smov 64  }
 0x26a   : > { %830 = vmatpush.msra.mxu3 %v804_v48 }
 0x26b   : > { %1354 = vmatmul.msk.f32.vlgmr.msra.gmra.mxu3 %vm808_vm3, %v1706_v50 }
 0x273   : > { %1355 = vmatmul.msk.f32.gmra.mxu3 %vm808_vm3, %v1713_v30 }
 0x2ee   : > { %v832_v28 = vpop.f32.mrf.mxu3 }
 0x2ef   : > { %v838_v52 = vadd.f32 %v832_v28, %v1601_v9 }
 0x2f1   : > { %v859_v55 = vmul.f32 %v838_v52, %v838_v52  ;;  %v842_v57 = vsel %vm584_vm1, %v838_v52, 0.0 }
 0x2f3   : > { %v861_v62 = vsel %vm584_vm1, %v859_v55, 0.0 }
 0x2f6   : > { %v835_v54 = vpop.f32.mrf.mxu3 }
 0x2f7   : > { %v839_v56 = vadd.f32 %v835_v54, %v1603_v10 }
 0x2f9   : > { %v843_v58 = vsel %vm584_vm1, %v839_v56, 0.0  ;;  %v860_v60 = vmul.f32 %v839_v56, %v839_v56 }
 0x2fa   : > { %v844_v61 = vadd.f32 %v843_v58, %v842_v57 }
 0x2fb   : > { %v862_v63 = vsel %vm584_vm1, %v860_v60, 0.0 }
 0x2fc   : > { %v845_v0 = vrot.slane %v844_v61, 4  ;;  %v863_v1 = vadd.f32 %v862_v63, %v861_v62 }
 0x2fe   : > { %v846_v3 = vadd.f32 %v845_v0, %v844_v61  ;;  %v864_v4 = vrot.slane %v863_v1, 4 }
 0x300   : > { %v847_v5 = vrot.slane %v846_v3, 2  ;;  %v865_v6 = vadd.f32 %v864_v4, %v863_v1 }
 0x302   : > { %v848_v8 = vadd.f32 %v847_v5, %v846_v3  ;;  %v866_v11 = vrot.slane %v865_v6, 2 }
 0x304   : > { %v849_v12 = vrot.slane %v848_v8, 1  ;;  %v867_v13 = vadd.f32 %v866_v11, %v865_v6 }
 0x306   : > { %v850_v17 = vadd.f32 %v849_v12, %v848_v8  ;;  %v868_v18 = vrot.slane %v867_v13, 1 }
 0x308   : > { %v858_v21 = vmul.f32 %v1725_v16, %v850_v17  ;;  %v869_v32 = vadd.f32 %v868_v18, %v867_v13 }
 0x30a   : > { %v870_v33 = vmul.f32 %v869_v32, %v1725_v16  ;;  %v871_v34 = vmul.f32 %v858_v21, %v858_v21  ;;  %v874_v43 = vsub.f32 %v838_v52, %v858_v21  ;;  %v875_v46 = vsub.f32 %v839_v56, %v858_v21  ;;  %v1416_v56 = vld [vmem:[%s550_s18] ss:$0 sm:$0xff] }
 0x30c   : > { %v872_v35 = vsub.f32 %v870_v33, %v871_v34 }
 0x30e   : > { %v873_v31 = vmax.f32 %v872_v35, 0.0 }
 0x310   : > { %v876_v36 = vadd.f32 1e-05, %v873_v31 }
 0x312   : > { %1437 = vrsqrt.f32 %v876_v36  ;;  %vm883_vm6 = vweird.f32 %v876_v36 }
 0x318   : > { %v1438_v37 = vpop.eup %1437 }
 0x319   : > { %v878_v38 = vmul.f32 %v1438_v37, %v876_v36  ;;  %vm884_vm5 = vweird.f32 %v1438_v37 }
 0x31a   : > { %vm885_vm7 = vmor %vm883_vm6, %vm884_vm5 }
 0x31b   : > { %v879_v39 = vmul.f32 %v1438_v37, %v878_v38 }
 0x31d   : > { %v880_v40 = vmul.f32 0.5, %v879_v39 }
 0x31f   : > { %v881_v41 = vsub.f32 1.5, %v880_v40 }
 0x321   : > { %v882_v42 = vmul.f32 %v1438_v37, %v881_v41 }
 0x323   : > { %v886_v45 = vsel %vm885_vm7, %v1438_v37, %v882_v42 }
 0x324   : > { %v887_v47 = vmul.f32 %v886_v45, %v874_v43  ;;  %v888_v48 = vmul.f32 %v886_v45, %v875_v46 }
 0x326   : > { %v892_v29 = vmul.f32 %v1414_v44, %v887_v47  ;;  %v893_v53 = vmul.f32 %v1414_v44, %v888_v48 }
 0x328   : > { %v897_v28 = vadd.f32 %v1415_v49, %v892_v29  ;;  %v898_v52 = vadd.f32 %v1415_v49, %v893_v53 }
 0x32a   : > { %v899_v51 = vmax.f32 %v897_v28, 0.0  ;;  %v900_v54 = vmax.f32 %v898_v52, 0.0 }
 0x32c   : > { %1356 = vmatmul.msk.f32.vlgmr.msra.gmra.mxu0 %vm584_vm1, %v899_v51 }
 0x334   : > { %1357 = vmatmul.msk.f32.gmra.mxu0 %vm584_vm1, %v900_v54 }
 0x3a9   : > { %v930_v55 = vpop.f32.mrf.mxu0 }
 0x3aa   : > { %v1746_v58 = vadd.f32 %v1416_v56, %v930_v55 }
 0x3b1   : > { %v933_v57 = vpop.f32.mrf.mxu0 }
 0x3b2   : > { %v1748_v59 = vadd.f32 %v1416_v56, %v933_v57 }
 0x3b4   : > { %v1408_v60 = vpack.i.bf16 %v1746_v58, %v1748_v59 }
 0x3b6   : > { %1409 = vrot.lane.b32.xlu1 %v1408_v60, %s1467_s5  ;;  %1404 = vrot.lane.b32.xlu0 %v1408_v60, %s1466_s4 }
 0x428   : > { %v1410_v61 = vpop.permute.xlu1 %1409  ;;  %v1405_v62 = vpop.permute.xlu0 %1404 }
 0x429   : > { %v1407_v63 = vunpack.i.h.bf16 %v1405_v62  ;;  %v1406_v0 = vunpack.i.l.bf16 %v1405_v62  ;;  %v1411_v1 = vunpack.i.l.bf16 %v1410_v61  ;;  %v1412_v2 = vunpack.i.h.bf16 %v1410_v61 }
 0x42b   : > { %1011 = vmatpush.msrb.mxu0 %v1411_v1  ;;  %v951_v3 = vsel %vm584_vm1, %v1406_v0, %v1411_v1  ;;  %v950_v4 = vsel %vm584_vm1, %v1407_v63, %v1412_v2 }
 0x42c   : > { %966 = vmatpush.msrb.mxu3 %v951_v3 }
 0x42d   : > { %1012 = vmatpush.msrb.mxu0 %v1412_v2 }
 0x42e   : > { %967 = vmatpush.msrb.mxu3 %v950_v4  ;;  %1362 = vmatmul.msk.f32.vlgmr.msrb.gmra.mxu0 %vm584_vm1, %v1613_v19 }
 0x42f   : > { %1358 = vmatmul.msk.f32.vlgmr.msrb.gmra.mxu3 %vm584_vm1, %v1618_v20 }
 0x436   : > { %1363 = vmatmul.msk.f32.gmra.mxu0 %vm584_vm1, %v1628_v22 }
 0x437   : > { %1359 = vmatmul.msk.f32.gmra.mxu3 %vm584_vm1, %v1633_v23 }
 0x43e   : > { %1364 = vmatmul.msk.f32.gmra.mxu0 %vm584_vm1, %v1656_v26 }
 0x43f   : > { %1360 = vmatmul.msk.f32.gmra.mxu3 %vm584_vm1, %v1642_v24 }
 0x446   : > { %1365 = vmatmul.msk.f32.gmra.mxu0 %vm584_vm1, %v1663_v27 }
 0x447   : > { %1361 = vmatmul.msk.f32.gmra.mxu3 %vm584_vm1, %v1649_v25 }
 0x4ab   : > { %v1014_v24 = vpop.f32.mrf.mxu0 }
 0x4b2   : > { %v1772_v19 = vpop.f32.mrf.mxu3 }
 0x4b3   : > { %v1017_v25 = vpop.f32.mrf.mxu0 }
 0x4ba   : > { %v1774_v20 = vpop.f32.mrf.mxu3 }
 0x4bb   : > { %987 = vrot.lane.b32.xlu1 %v1774_v20, %s1466_s4  ;;  %v1020_v26 = vpop.f32.mrf.mxu0 }
 0x4c2   : > { %v1778_v22 = vpop.f32.mrf.mxu3 }
 0x4c3   : > { %1187 = vrot.lane.b32.xlu1 %v1603_v10, %s1469_s28  ;;  %989 = vrot.lane.b32.xlu0 %v1778_v22, %s1466_s4  ;;  %v1023_v27 = vpop.f32.mrf.mxu0 }
 0x4ca   : > { %v978_v23 = vpop.f32.mrf.mxu3 }
 0x4cb   : > { %1185 = vrot.lane.b32.xlu0 %v1601_v9, %s1469_s28  ;;  %991 = vrot.lane.b32.xlu2 %v978_v23, %s1466_s4 }
 0x4d3   : > { %985 = vrot.lane.b32.xlu2 %v1772_v19, %s1466_s4 }
 0x525   : > { %v992_v5 = vpop.permute.xlu2 %991 }
 0x526   : > { %v1024_v6 = vadd.f32 %v1023_v27, %v992_v5 }
 0x528   : > { %v1369_v7 = vmul.f32 -1.442695, %v1024_v6 }
 0x52a   : > { %1439 = vpow2.f32 %v1369_v7 }
 0x52d   : > { %v988_v10 = vpop.permute.xlu1 %987  ;;  %v986_v8 = vpop.permute.xlu2 %985 }
 0x52e   : > { %v1018_v11 = vadd.f32 %v1017_v25, %v988_v10  ;;  %v1015_v12 = vadd.f32 %v1014_v24, %v986_v8 }
 0x530   : > { %v1440_v13 = vpop.eup %1439  ;;  %v1367_v14 = vmul.f32 -1.442695, %v1018_v11  ;;  %v1366_v9 = vmul.f32 -1.442695, %v1015_v12 }
 0x531   : > { %v1041_v15 = vadd.f32 1.0, %v1440_v13 }
 0x532   : > { %1441 = vpow2.f32 %v1367_v14 }
 0x533   : > { %1443 = vrcp.f32 %v1041_v15  ;;  %v1098_v37 = vand.u32 2147483648, %v1041_v15  ;;  %vm1092_vm8 = vweird.f32 %v1041_v15  ;;  %v1096_v39 = vand.u32 2147483647, %v1041_v15 }
 0x534   : > { %1445 = vpow2.f32 %v1366_v9 }
 0x535   : > { %v990_v17 = vpop.permute.xlu0 %989  ;;  %v1099_v41 = vor.u32 1.1754944e-38, %v1098_v37  ;;  %vm1097_vm11 = vcmp.eq.f32.partialorder %v1096_v39, 8.507059e+37 }
 0x536   : > { %v1021_v18 = vadd.f32 %v1020_v26, %v990_v17 }
 0x538   : > { %v1442_v21 = vpop.eup %1441  ;;  %v1368_v32 = vmul.f32 -1.442695, %v1021_v18 }
 0x539   : > { %v1444_v33 = vpop.eup %1443  ;;  %v1039_v34 = vadd.f32 1.0, %v1442_v21 }
 0x53a   : > { %v1446_v35 = vpop.eup %1445  ;;  %1447 = vpow2.f32 %v1368_v32  ;;  %v1088_v31 = vmul.f32 %v1444_v33, %v1041_v15  ;;  %vm1093_vm9 = vweird.f32 %v1444_v33 }
 0x53b   : > { %1449 = vrcp.f32 %v1039_v34  ;;  %v1038_v36 = vadd.f32 1.0, %v1446_v35  ;;  %vm1094_vm10 = vmor %vm1092_vm8, %vm1093_vm9  ;;  %vm1062_vm12 = vweird.f32 %v1039_v34  ;;  %v1066_v62 = vand.u32 2147483647, %v1039_v34 }
 0x53c   : > { %v1089_v38 = vsub.f32 1.0, %v1088_v31  ;;  %v1068_v63 = vand.u32 2147483648, %v1039_v34 }
 0x53d   : > { %1451 = vrcp.f32 %v1038_v36  ;;  %vm1047_vm2 = vweird.f32 %v1038_v36  ;;  %v1053_v4 = vand.u32 2147483648, %v1038_v36  ;;  %v1051_v25 = vand.u32 2147483647, %v1038_v36 }
 0x53e   : > { %v1090_v40 = vmul.f32 %v1444_v33, %v1089_v38  ;;  %v1069_v27 = vor.u32 1.1754944e-38, %v1068_v63  ;;  %vm1067_vm8 = vcmp.eq.f32.partialorder %v1066_v62, 8.507059e+37 }
 0x53f   : > { %v1054_v8 = vor.u32 1.1754944e-38, %v1053_v4  ;;  %vm1052_vm9 = vcmp.eq.f32.partialorder %v1051_v25, 8.507059e+37  ;;  %v1188_v4 = vpop.permute.xlu1 %1187 }
 0x540   : > { %v1448_v42 = vpop.eup %1447  ;;  %v1091_v43 = vadd.f32 %v1444_v33, %v1090_v40 }
 0x541   : > { %v1450_v44 = vpop.eup %1449  ;;  %v1040_v45 = vadd.f32 1.0, %v1448_v42 }
 0x542   : > { %v1095_v46 = vsel %vm1094_vm10, %v1444_v33, %v1091_v43  ;;  %v1058_v47 = vmul.f32 %v1450_v44, %v1039_v34  ;;  %vm1063_vm13 = vweird.f32 %v1450_v44 }
 0x543   : > { %v1452_v49 = vpop.eup %1451  ;;  %1453 = vrcp.f32 %v1040_v45  ;;  %v1100_v48 = vsel %vm1097_vm11, %v1099_v41, %v1095_v46  ;;  %v1083_v61 = vand.u32 2147483648, %v1040_v45  ;;  %v1081_v1 = vand.u32 2147483647, %v1040_v45  ;;  %vm1787_vm0 = vmor %vm1062_vm12, %vm1063_vm13 }
 0x544   : > { %v1105_v29 = vmul.f32 %v1100_v48, %v978_v23  ;;  %v1059_v28 = vsub.f32 1.0, %v1058_v47  ;;  %v1043_v51 = vmul.f32 %v1452_v49, %v1038_v36  ;;  %vm1048_vm14 = vweird.f32 %v1452_v49 }
 0x545   : > { %vm1077_vm4 = vweird.f32 %v1040_v45  ;;  %vm1049_vm5 = vmor %vm1047_vm2, %vm1048_vm14  ;;  %v1084_v26 = vor.u32 1.1754944e-38, %v1083_v61  ;;  %vm1082_vm7 = vcmp.eq.f32.partialorder %v1081_v1, 8.507059e+37  ;;  %v1418_v61 = vld [vmem:[%s556_s24] ss:$0 sm:$0xff]  ;;  %s1871_s24 = sld [smem:[#allocation6_spill]] (!%p1372_p5) }
 0x546   : > { %1118 = vmatpush.msrb.mxu1 %v1105_v29  ;;  %v1044_v53 = vsub.f32 1.0, %v1043_v51  ;;  %v1060_v52 = vmul.f32 %v1450_v44, %v1059_v28 }
 0x548   : > { %v1045_v56 = vmul.f32 %v1452_v49, %v1044_v53  ;;  %v1061_v60 = vadd.f32 %v1450_v44, %v1060_v52 }
 0x549   : > { %v1454_v54 = vpop.eup %1453 }
 0x54a   : > { %v1073_v55 = vmul.f32 %v1454_v54, %v1040_v45  ;;  %vm1078_vm15 = vweird.f32 %v1454_v54  ;;  %v1046_v2 = vadd.f32 %v1452_v49, %v1045_v56  ;;  %v1065_v24 = vsel %vm1787_vm0, %v1450_v44, %v1061_v60 }
 0x54b   : > { %vm1079_vm6 = vmor %vm1077_vm4, %vm1078_vm15  ;;  %v1070_v10 = vsel %vm1067_vm8, %v1069_v27, %v1065_v24 }
 0x54c   : > { %v1074_v57 = vsub.f32 1.0, %v1073_v55  ;;  %v1050_v6 = vsel %vm1049_vm5, %v1452_v49, %v1046_v2  ;;  %v1103_v13 = vmul.f32 %v1070_v10, %v1774_v20 }
 0x54d   : > { %v1055_v12 = vsel %vm1052_vm9, %v1054_v8, %v1050_v6 }
 0x54e   : > { %v1075_v0 = vmul.f32 %v1454_v54, %v1074_v57  ;;  %v1102_v14 = vmul.f32 %v1055_v12, %v1772_v19 }
 0x550   : > { %v1076_v23 = vadd.f32 %v1454_v54, %v1075_v0 }
 0x552   : > { %v1080_v5 = vsel %vm1079_vm6, %v1454_v54, %v1076_v23  ;;  %v1186_v23 = vpop.permute.xlu0 %1185 }
 0x553   : > { %v1085_v7 = vsel %vm1082_vm7, %v1084_v26, %v1080_v5 }
 0x554   : > { %v1104_v11 = vmul.f32 %v1085_v7, %v1778_v22 }
 0x556   : > { %1119 = vmatpush.msrb.mxu1 %v1104_v11 }
 0x558   : > { %1120 = vmatpush.msrb.mxu1 %v1103_v13 }
 0x55a   : > { %1121 = vmatpush.msrb.mxu1 %v1102_v14 }
 0x55b   : > { %1370 = vmatmul.msk.f32.vlgmr.msrb.gmra.mxu1 %vm808_vm3, %v1706_v50 }
 0x563   : > { %1371 = vmatmul.msk.f32.gmra.mxu1 %vm808_vm3, %v1713_v30 }
 0x5d8   : > { %v1123_v9 = vpop.f32.mrf.mxu1 }
 0x5d9   : > { %v1129_v15 = vadd.f32 %v1123_v9, %v1746_v58 }
 0x5db   : > { %v1143_v22 = vmul.f32 %v1129_v15, %v1129_v15  ;;  %v1133_v21 = vsel %vm584_vm1, %v1129_v15, 0.0 }
 0x5dd   : > { %v1145_v33 = vsel %vm584_vm1, %v1143_v22, 0.0 }
 0x5e0   : > { %v1126_v17 = vpop.f32.mrf.mxu1 }
 0x5e1   : > { %v1130_v18 = vadd.f32 %v1126_v17, %v1748_v59 }
 0x5e3   : > { %v1134_v20 = vsel %vm584_vm1, %v1130_v18, 0.0  ;;  %v1144_v32 = vmul.f32 %v1130_v18, %v1130_v18 }
 0x5e4   : > { %v1135_v19 = vadd.f32 %v1134_v20, %v1133_v21 }
 0x5e5   : > { %v1146_v50 = vsel %vm584_vm1, %v1144_v32, 0.0 }
 0x5e6   : > { %v1136_v34 = vrot.slane %v1135_v19, 4  ;;  %v1147_v35 = vadd.f32 %v1146_v50, %v1145_v33 }
 0x5e8   : > { %v1137_v30 = vadd.f32 %v1136_v34, %v1135_v19  ;;  %v1148_v31 = vrot.slane %v1147_v35, 4 }
 0x5ea   : > { %v1138_v36 = vrot.slane %v1137_v30, 2  ;;  %v1149_v58 = vadd.f32 %v1148_v31, %v1147_v35 }
 0x5ec   : > { %v1139_v37 = vadd.f32 %v1138_v36, %v1137_v30  ;;  %v1150_v38 = vrot.slane %v1149_v58, 2 }
 0x5ee   : > { %v1140_v39 = vrot.slane %v1139_v37, 1  ;;  %v1151_v59 = vadd.f32 %v1150_v38, %v1149_v58 }
 0x5f0   : > { %v1141_v40 = vadd.f32 %v1140_v39, %v1139_v37  ;;  %v1152_v41 = vrot.slane %v1151_v59, 1 }
 0x5f2   : > { %v1142_v42 = vmul.f32 %v1141_v40, %v1725_v16  ;;  %v1153_v43 = vadd.f32 %v1152_v41, %v1151_v59 }
 0x5f4   : > { %v1154_v44 = vmul.f32 %v1153_v43, %v1725_v16  ;;  %v1155_v45 = vmul.f32 %v1142_v42, %v1142_v42  ;;  %v1158_v54 = vsub.f32 %v1129_v15, %v1142_v42  ;;  %v1159_v55 = vsub.f32 %v1130_v18, %v1142_v42  ;;  %v1417_v16 = vld [vmem:[%s553_s21] ss:$0 sm:$0xff] }
 0x5f6   : > { %v1156_v46 = vsub.f32 %v1154_v44, %v1155_v45 }
 0x5f8   : > { %v1157_v47 = vmax.f32 %v1156_v46, 0.0 }
 0x5fa   : > { %v1160_v49 = vadd.f32 1e-05, %v1157_v47 }
 0x5fc   : > { %1455 = vrsqrt.f32 %v1160_v49  ;;  %vm1167_vm10 = vweird.f32 %v1160_v49 }
 0x602   : > { %v1456_v48 = vpop.eup %1455 }
 0x603   : > { %v1162_v29 = vmul.f32 %v1456_v48, %v1160_v49  ;;  %vm1168_vm3 = vweird.f32 %v1456_v48 }
 0x604   : > { %vm1169_vm11 = vmor %vm1167_vm10, %vm1168_vm3 }
 0x605   : > { %v1163_v28 = vmul.f32 %v1456_v48, %v1162_v29 }
 0x607   : > { %v1164_v51 = vmul.f32 0.5, %v1163_v28 }
 0x609   : > { %v1165_v53 = vsub.f32 1.5, %v1164_v51 }
 0x60b   : > { %v1166_v52 = vmul.f32 %v1456_v48, %v1165_v53 }
 0x60d   : > { %v1170_v56 = vsel %vm1169_vm11, %v1456_v48, %v1166_v52 }
 0x60e   : > { %v1171_v57 = vmul.f32 %v1170_v56, %v1158_v54  ;;  %v1172_v60 = vmul.f32 %v1170_v56, %v1159_v55 }
 0x610   : > { %v1176_v62 = vmul.f32 %v1417_v16, %v1171_v57  ;;  %v1177_v63 = vmul.f32 %v1417_v16, %v1172_v60 }
 0x612   : > { %v1181_v0 = vadd.f32 %v1418_v61, %v1176_v62  ;;  %v1182_v1 = vadd.f32 %v1418_v61, %v1177_v63 }
 0x614   : > { %v1183_v2 = vmax.f32 %v1181_v0, 0.0  ;;  %v1184_v3 = vmax.f32 %v1182_v1, 0.0 }
 0x615   : > { %1198 = sbr.rel (%p1372_p5) target bundleno = 1696 (0x6a0), region = 84 }
 0x616   : > { %v1191_v24 = vadd.f32 %v1186_v23, %v1183_v2  ;;  %v1192_v25 = vadd.f32 %v1188_v4, %v1184_v3 }
 0x618   : > { %1193 = vst.msk [vmem:[#allocation2] sm:$0xff] %vm584_vm1, %v1191_v24 }
 0x619   : > { %1194 = vst.msk [vmem:[#allocation2 + $0x8] sm:$0xff] %vm584_vm1, %v1192_v25 }
 0x61a   : > { %v1200_v26 = vld [vmem:[%s1871_s24 + $0x8] sm:$0xff]  ;;  %v1199_v27 = vld [vmem:[%s1871_s24] sm:$0xff]  ;;  %vm1234_vm12 = vcmask 15360  }
 0x61b   : > { %1225 = vmatpush.msra.mxu0 %v1200_v26  ;;  %1379 = vmatpush.msra.mxu1 %v1200_v26  ;;  %v1457_v5 = vld [vmem:[%s1872_s30] ss:$0 sm:$0xff] }
 0x61d   : > { %1226 = vmatpush.msra.mxu0 %v1199_v27  ;;  %1380 = vmatpush.msra.mxu1 %v1199_v27 }
 0x61e   : > { %1373 = vmatmul.msk.f32.vlgmr.msra.gmra.mxu0 %vm584_vm1, %v1191_v24  ;;  %1374 = vmatmul.msk.f32.vlgmr.msra.gmra.mxu1 %vm584_vm1, %v1192_v25 }
 0x69b   : > { %v1228_v6 = vpop.f32.mrf.mxu0  ;;  %v1231_v7 = vpop.f32.mrf.mxu1 }
 0x69c   : > { %v1229_v10 = vadd.f32 %v1457_v5, %v1228_v6  ;;  %v1232_v8 = vadd.f32 %v1457_v5, %v1231_v7 }
 0x69e   : > { %1235 = vst.msk [vmem:[%s1873_s13] sm:$0xff] %vm1234_vm12, %v1229_v10 }
 0x69f   : > { %1236 = vst.msk [vmem:[%s1873_s13 + $0x8] sm:$0xff] %vm1234_vm12, %v1232_v8 }
 0x6a0 PF: > { %s1874_s12 = sld [smem:[#allocation3_spill]] }
 0x6a6   : > { %s24_s29 = sadd.s32 1, %s1874_s12  }
 0x6a7   : > { %p21_p6 = scmp.ge.s32.totalorder %s24_s29, 4  }
 0x6a9   :  { %23 = sbr.rel (!%p21_p6) target bundleno = 6 (0x6), region = 131 }

</bundles_post_ra>
